<compile_context>
chip_gen: v7x
topology: tpu7x:2x2x1
jax: 0.10.0
libtpu: 0.0.40
codegen_flags: <defaults>
</compile_context>

<pallas_src>
import jax
import jax.numpy as jnp
from jax.experimental import pallas as pl
from jax.experimental.pallas import tpu as pltpu

_SUBLANE = 8            # sublane tile of a vreg (second-to-last dim alignment)
_TB_MAX = 8192          # max batch rows per grid step (1 MiB tile at D=32)
_FAST_PATH_MAX_B = 512  # below this, plain fused XLA beats any Pallas dispatch


def _neuron_kernel(x_ref, w_ref, b_ref, o_ref):
    # x tile: (tb, D) in native layout; w: (D, 1); b: scalar in SMEM.
    # Per-row dot -> (tb, 1), then fused bias + tanh (EUP), masked (tb, 1) store.
    z = jnp.dot(x_ref[...], w_ref[...], preferred_element_type=jnp.float32)
    o_ref[...] = jnp.tanh(z + b_ref[0, 0]).astype(o_ref.dtype)


def _cdiv(a, b):
    return -(-a // b)


def _round_up(n, m):
    return _cdiv(n, m) * m


def single_neuron_forward(x, w, b, *, min_pallas_batch=_FAST_PATH_MAX_B):
    """x: (B, D) f32, w: (D, 1) f32, b: (1, 1) f32 -> (B, 1) f32."""
    B, D = x.shape

    # ---- Small-batch fast path (the B=8 MCTS-leaf case): one fused XLA op. ----
    if B <= min_pallas_batch:
        return jnp.tanh(x @ w + b)

    # ---- Tile selection: one big tile if possible, else a few large tiles. ----
    if B <= _TB_MAX:
        tb = B                      # single grid step; full-dim block, no padding
        steps = 1
    else:
        steps = _cdiv(B, _TB_MAX)
        if steps % 2 == 1:          # even share per TensorCore on v7x megacore
            steps += 1
        tb = _round_up(_cdiv(B, steps), _SUBLANE)   # sublane-aligned tile
        steps = _cdiv(B, tb)        # ragged last tile handled by Pallas masking

    # Double-buffered input tile + output tile + weight column, plus headroom.
    vmem_bytes = 2 * (tb * D + tb) * 4 + D * 4 + (1 << 20)
    vmem_bytes = max(vmem_bytes, 16 * 1024 * 1024)

    return pl.pallas_call(
        _neuron_kernel,
        out_shape=jax.ShapeDtypeStruct((B, 1), jnp.float32),
        grid_spec=pl.GridSpec(
            grid=(steps,),
            in_specs=[
                pl.BlockSpec((tb, D), lambda i: (i, 0)),              # native x tile
                pl.BlockSpec((D, 1), lambda i: (0, 0)),               # weight column
                pl.BlockSpec(memory_space=pltpu.MemorySpace.SMEM),    # bias scalar
            ],
            out_specs=pl.BlockSpec((tb, 1), lambda i: (i, 0)),
        ),
        compiler_params=pltpu.CompilerParams(
            dimension_semantics=("parallel",),    # megacore sharding on v7x
            vmem_limit_bytes=vmem_bytes,
        ),
    )(x, w, b)


def reference_forward(x, w, b):
    return jnp.tanh(x @ w + b)


if __name__ == "__main__":
    key = jax.random.PRNGKey(0)
    k_x, k_w, k_b = jax.random.split(key, 3)

    # Shapes consistent with the module: a board encoding flattened to D
    # features (e.g. a 4x8 board -> D = 32), MCTS-leaf batch = 8.
    B, D = 8, 32
    x = jax.random.normal(k_x, (B, D), dtype=jnp.float32)

    # Deterministic PyTorch-style Linear init: U(-1/sqrt(D), 1/sqrt(D)).
    bound = 1.0 / jnp.sqrt(jnp.float32(D))
    w = jax.random.uniform(k_w, (D, 1), minval=-bound, maxval=bound, dtype=jnp.float32)
    b = jax.random.uniform(k_b, (1, 1), minval=-bound, maxval=bound, dtype=jnp.float32)

    # 1) Tiny batch: fast fused-XLA path (no Pallas dispatch).
    out_small = jax.block_until_ready(single_neuron_forward(x, w, b))
    ref_small = reference_forward(x, w, b)
    assert out_small.shape == (B, 1)
    assert jnp.allclose(out_small, ref_small, atol=1e-5, rtol=1e-5)

    # 2) Same tiny batch forced through the Pallas kernel (single grid step,
    #    full-dim blocks) to validate the kernel path at small shapes.
    out_small_k = jax.block_until_ready(
        single_neuron_forward(x, w, b, min_pallas_batch=0))
    assert out_small_k.shape == (B, 1)
    assert jnp.allclose(out_small_k, ref_small, atol=1e-5, rtol=1e-5)

    # 3) Stacked-leaves batch: Pallas path, one large (1200, 32) tile, 1 step.
    B2 = 1200
    x2 = jax.random.normal(k_x, (B2, D), dtype=jnp.float32)
    out2 = jax.block_until_ready(single_neuron_forward(x2, w, b))
    ref2 = reference_forward(x2, w, b)
    assert out2.shape == (B2, 1)
    assert jnp.allclose(out2, ref2, atol=1e-5, rtol=1e-5)

    # 4) Multi-step grid: even step count (v7x megacore balance) + ragged
    #    last tile exercising Pallas' out-of-bounds masking.
    B3 = 9001
    x3 = jax.random.normal(k_x, (B3, D), dtype=jnp.float32)
    out3 = jax.block_until_ready(single_neuron_forward(x3, w, b))
    ref3 = reference_forward(x3, w, b)
    assert out3.shape == (B3, 1)
    assert jnp.allclose(out3, ref3, atol=1e-5, rtol=1e-5)

    # TODO(synk): the module's __init__ also declares unused `value`, `backbone`,
    # `policy_head`, `value_head` layers that never appear in forward(); only the
    # forward-path single neuron (Linear -> tanh) is implemented here.
    print("KERNEL_OK")
</pallas_src>

<mosaic_0001>
module attributes {stable_mosaic.version = 11 : i64} {
  func.func @_neuron_kernel(%arg0: i32, %arg1: memref<8x32xf32, #tpu.memory_space<vmem>>, %arg2: memref<32x1xf32, #tpu.memory_space<vmem>>, %arg3: memref<1x1xf32, #tpu.memory_space<smem>>, %arg4: memref<8x1xf32, #tpu.memory_space<vmem>>) attributes {dimension_semantics = [#tpu.dimension_semantics<parallel>], iteration_bounds = array<i64: 1>, scalar_prefetch = 0 : i64, scratch_operands = 0 : i64, tpu.core_type = #tpu.core_type<tc>, window_params = [{transform_indices = @transform_0, window_bounds = array<i64: 8, 32>}, {pipeline_mode = #tpu.pipeline_mode<synchronous>, transform_indices = @transform_1, window_bounds = array<i64: 32, 1>}, {transform_indices = @transform_2, window_bounds = array<i64: 1, 1>}, {transform_indices = @transform_3, window_bounds = array<i64: 8, 1>}]} {
    %c0 = arith.constant 0 : index
    %c0_0 = arith.constant 0 : index
    %0 = vector.load %arg1[%c0, %c0_0] : memref<8x32xf32, #tpu.memory_space<vmem>>, vector<8x32xf32>
    %c0_1 = arith.constant 0 : index
    %c0_2 = arith.constant 0 : index
    %1 = vector.load %arg2[%c0_1, %c0_2] : memref<32x1xf32, #tpu.memory_space<vmem>>, vector<32x1xf32>
    %cst = arith.constant dense<0.000000e+00> : vector<8x1xf32>
    %2 = tpu.matmul %0, %1, %cst {dimension_numbers = #tpu.dot_dimension_numbers<[1], [0], [0], [1], [0, 0, 1, 1], [], []>} : vector<8x32xf32>, vector<32x1xf32>, vector<8x1xf32> -> vector<8x1xf32>
    %c0_3 = arith.constant 0 : index
    %c0_4 = arith.constant 0 : index
    %3 = memref.load %arg3[%c0_3, %c0_4] : memref<1x1xf32, #tpu.memory_space<smem>>
    %4 = vector.broadcast %3 : f32 to vector<8x1xf32>
    %5 = arith.addf %2, %4 : vector<8x1xf32>
    %6 = math.tanh %5 : vector<8x1xf32>
    %c0_5 = arith.constant 0 : index
    %c0_6 = arith.constant 0 : index
    %7 = vector.load %arg4[%c0_5, %c0_6] : memref<8x1xf32, #tpu.memory_space<vmem>>, vector<8x1xf32>
    tpu.vector_store %arg4[%c0_5, %c0_6], %6 {strides = array<i32>} : memref<8x1xf32, #tpu.memory_space<vmem>>, vector<8x1xf32>,
    return
  }
  func.func @transform_0(%arg0: i32) -> (i32, i32) {
    %c0_i32 = arith.constant 0 : i32
    %c0_i32_0 = arith.constant 0 : i32
    return %arg0, %c0_i32 : i32, i32
  }
  func.func @transform_1(%arg0: i32) -> (i32, i32) {
    %c0_i32 = arith.constant 0 : i32
    %c0_i32_0 = arith.constant 0 : i32
    %c0_i32_1 = arith.constant 0 : i32
    return %c0_i32, %c0_i32_0 : i32, i32
  }
  func.func @transform_2(%arg0: i32) -> (i32, i32) {
    %c0_i32 = arith.constant 0 : i32
    %c0_i32_0 = arith.constant 0 : i32
    %c0_i32_1 = arith.constant 0 : i32
    return %c0_i32, %c0_i32_0 : i32, i32
  }
  func.func @transform_3(%arg0: i32) -> (i32, i32) {
    %c0_i32 = arith.constant 0 : i32
    %c0_i32_0 = arith.constant 0 : i32
    return %arg0, %c0_i32 : i32, i32
  }
}

</mosaic_0001>

<bundles_post_ra>
// kernel: tpu_custom_call.1
= control target key start
LH: loop header
LB: loop body
LE: loop exit
PB: predicated region body
PF: predicated region fallthrough
CT: control target
= control target key end

     0   :  { %v131_v0 = vmov 0.0|0.0   ;;  %vm132_vm0 = vmmov 0   ;;  %v133_v4 = vmov 0.0   ;;  %vm22_vm1 = vcmask 261120   ;;  %s175_s1 = inlined_call_operand.vmem [shape: f32[32,1], index: 1, kind: input, shape index: {}]   ;;  %s176_s0 = inlined_call_operand.vmem [shape: f32[8,32], index: 0, kind: input, shape index: {}]   ;;  %s177_s2 = inlined_call_operand.<no memory space> [shape: f32[1,1], index: 2, kind: input, shape index: {}]   ;;  %s178_s3 = inlined_call_operand.vmem [shape: f32[8,1], index: 3, kind: output, shape index: {}]  }
   0x1   :  { %120 = vmatprep.subr.bf16.mxu0 %v131_v0  ;;  %v16_v1 = vld [vmem:[%s175_s1] sm:$0xff]  ;;  %v17_v2 = vld [vmem:[%s175_s1 + $0x8] sm:$0xff]  ;;  %v18_v3 = vld [vmem:[%s175_s1 + $0x10] sm:$0xff]  ;;  %117 = vmatprep.mubr.msk.f32.mxu0 %vm132_vm0, %v133_v4  ;;  %v21_v9 = vstv %s177_s2  ;;  %vm97_vm2 = vcmask 7168  }
   0x2   :  { %v121_v5 = vpack.c.bf16 %v17_v2, %v16_v1  ;;  %v19_v6 = vld [vmem:[%s175_s1 + $0x18] sm:$0xff]  ;;  %v15_v8 = vld [vmem:[%s176_s0] sm:$0xff] }
   0x3   :  { %v124_v7 = vpack.c.bf16 %v19_v6, %v18_v3 }
   0x4   :  { %122 = vmatpush3.bf16.msra.mxu0 %v121_v5 }
   0x5   :  { %123 = vmatprep.subr.bf16.mxu0 %v131_v0 }
   0x8   :  { %125 = vmatpush3.bf16.msra.mxu0 %v124_v7 }
   0xb   :  { %118 = vmatmul.mubr.msk.f32.vlgmr.msra.gmra.mrb[0].mxu0 %vm22_vm1, %v15_v8 }
  0xde   :  { %v92_v10 = vpop.f32.mrb[0].mxu0 }
  0xdf   :  { %v93_v11 = vadd.f32 %v92_v10, %v21_v9  ;;  %v119_v12 = vpop.f32.mrb[1].mxu0 }
  0xe1   :  { %129 = vtanh.f32 %v93_v11 }
  0xeb   :  { %v130_v13 = vpop.eup %129 }
  0xec   :  { %98 = vst.msk [vmem:[%s178_s3] sm:$0xff] %vm97_vm2, %v130_v13 }

</bundles_post_ra>
